<compile_context>
chip_gen: v6e
topology: v6e:2x2x1
jax: 0.10.0
libtpu: 0.0.40
codegen_flags: <defaults>
</compile_context>

<pallas_src>
import jax
import jax.numpy as jnp
from jax import lax
from jax.experimental import pallas as pl
from jax.experimental.pallas import tpu as pltpu

ACTOR_DIM = 9          # 3x3 board -> 9 actions
IN_PAD = 16            # flattened board (9) + bias column (1) + zero pad -> 16
HIDDEN = 64
OUT_PAD = 128          # lane-dense fused output slab width


def acnet_kernel(x_ref, w1_ref, wh_ref, bh_ref, out_ref):
    # Trunk: x_pad is (TM, 16) with column 9 == 1.0 (bias column); w1_ref is
    # (16, 64) with row 9 == b1, so this one dot is Linear(9,64)+bias.
    x = x_ref[...]
    h = jnp.maximum(
        jnp.dot(x, w1_ref[...],
                preferred_element_type=jnp.float32,
                precision=lax.Precision.HIGHEST),
        0.0,
    )                                                       # (TM, 64)

    # Fused heads: (64,128) weight = [Wa (cols 0..8) | Wc (col 9) | zeros].
    fused = jnp.dot(h, wh_ref[...],
                    preferred_element_type=jnp.float32,
                    precision=lax.Precision.HIGHEST)
    fused = fused + bh_ref[...]                             # (TM, 128)

    lane = lax.broadcasted_iota(jnp.int32, fused.shape, 1)  # (TM, 128)

    # Actor: softmax over lanes 0..8 only (padding lanes masked to -inf so
    # they contribute exp(-inf)=0 to the denominator).  Exact normalization
    # (no approx reciprocal) so sum(probs) == 1 to fp32 rounding.
    logits = jnp.where(lane < ACTOR_DIM, fused, -jnp.inf)
    m = jnp.max(logits, axis=-1, keepdims=True)
    e = jnp.exp(logits - m)
    denom = jnp.sum(e, axis=-1, keepdims=True)
    probs = e / denom                                       # lanes >= 9 are 0

    # Critic: tanh; only lane 9 (pre-activation = h @ Wc + bc) is selected.
    value = jnp.tanh(fused)

    out_ref[...] = jnp.where(lane == ACTOR_DIM, value, probs).astype(out_ref.dtype)


def _round_up(a, m):
    return ((a + m - 1) // m) * m


def pack_params(raw_params):
    """Pack raw (torch-style) params into the fused/padded kernel layout."""
    w1, b1, wa, ba, wc, bc = raw_params
    # (16, 64): rows 0..8 = W1 (stored (in,out)), row 9 = b1, rows 10..15 = 0.
    w1p = jnp.zeros((IN_PAD, HIDDEN), jnp.float32)
    w1p = w1p.at[:ACTOR_DIM, :].set(w1).at[ACTOR_DIM, :].set(b1)
    # (64, 128): cols 0..8 = Wa, col 9 = Wc, cols 10..127 = 0.
    wh = jnp.zeros((HIDDEN, OUT_PAD), jnp.float32)
    wh = wh.at[:, :ACTOR_DIM].set(wa).at[:, ACTOR_DIM].set(wc[:, 0])
    # (1, 128): lanes 0..8 = ba, lane 9 = bc, rest 0.
    bh = jnp.zeros((1, OUT_PAD), jnp.float32)
    bh = bh.at[0, :ACTOR_DIM].set(ba).at[0, ACTOR_DIM].set(bc[0])
    return (w1p, wh, bh)


def tictactoe_acnet_forward(x, packed_params, *, tm=512):
    """x: (B, 3, 3) -> (probs (B, 9), value (B, 1))."""
    w1p, wh, bh = packed_params
    B = x.shape[0]

    # Flatten board, pad to 16 lanes, set bias column (lane 9) to 1.0.
    x_flat = x.reshape(B, ACTOR_DIM).astype(jnp.float32)
    x_pad = jnp.pad(x_flat, ((0, 0), (0, IN_PAD - ACTOR_DIM)))
    x_pad = x_pad.at[:, ACTOR_DIM].set(1.0)

    # Batch tile: multiple of 8 sublanes, capped so small batches stay 1 step.
    TM = min(tm, _round_up(B, 8))
    B_pad = _round_up(B, TM)
    if B_pad != B:
        x_pad = jnp.pad(x_pad, ((0, B_pad - B), (0, 0)))

    out = pl.pallas_call(
        acnet_kernel,
        out_shape=jax.ShapeDtypeStruct((B_pad, OUT_PAD), jnp.float32),
        grid=(B_pad // TM,),
        in_specs=[
            pl.BlockSpec((TM, IN_PAD), lambda i: (i, 0)),       # x tile
            pl.BlockSpec((IN_PAD, HIDDEN), lambda i: (0, 0)),   # resident W1
            pl.BlockSpec((HIDDEN, OUT_PAD), lambda i: (0, 0)),  # resident fused heads
            pl.BlockSpec((1, OUT_PAD), lambda i: (0, 0)),       # resident head bias
        ],
        out_specs=pl.BlockSpec((TM, OUT_PAD), lambda i: (i, 0)),
        compiler_params=pltpu.CompilerParams(
            dimension_semantics=("parallel",)),
    )(x_pad, w1p, wh, bh)

    probs = out[:B, :ACTOR_DIM]
    value = out[:B, ACTOR_DIM:ACTOR_DIM + 1]
    return probs, value


def init_params(key):
    """Torch-default-style init; weights stored (in, out)."""
    ks = jax.random.split(key, 6)

    def lin(kw, kb, fan_in, fan_out):
        bound = 1.0 / jnp.sqrt(jnp.float32(fan_in))
        w = jax.random.uniform(kw, (fan_in, fan_out), jnp.float32, -bound, bound)
        b = jax.random.uniform(kb, (fan_out,), jnp.float32, -bound, bound)
        return w, b

    w1, b1 = lin(ks[0], ks[1], 9, 64)    # network Linear(9, 64)
    wa, ba = lin(ks[2], ks[3], 64, 9)    # actor   Linear(64, 9)
    wc, bc = lin(ks[4], ks[5], 64, 1)    # critic  Linear(64, 1)
    return (w1, b1, wa, ba, wc, bc)


def _reference(x, raw_params):
    w1, b1, wa, ba, wc, bc = raw_params
    B = x.shape[0]
    xf = x.reshape(B, 9).astype(jnp.float32)
    h = jnp.maximum(
        jnp.dot(xf, w1, precision=lax.Precision.HIGHEST) + b1, 0.0)
    logits = jnp.dot(h, wa, precision=lax.Precision.HIGHEST) + ba
    probs = jax.nn.softmax(logits, axis=-1)
    value = jnp.tanh(jnp.dot(h, wc, precision=lax.Precision.HIGHEST) + bc[None, :])
    return probs, value


if __name__ == "__main__":
    key = jax.random.PRNGKey(0)
    k_x, k_p, k_x2 = jax.random.split(key, 3)

    raw_params = init_params(k_p)
    packed = pack_params(raw_params)

    # Main run: B = 8 tic-tac-toe boards with entries in {-1, 0, 1}.
    B = 8
    x = jax.random.randint(k_x, (B, 3, 3), -1, 2).astype(jnp.float32)
    probs, value = tictactoe_acnet_forward(x, packed)
    jax.block_until_ready((probs, value))

    probs_ref, value_ref = _reference(x, raw_params)
    assert probs.shape == (B, 9) and value.shape == (B, 1)
    assert jnp.allclose(probs, probs_ref, atol=1e-4)
    assert jnp.allclose(value, value_ref, atol=1e-4)
    assert jnp.allclose(jnp.sum(probs, axis=-1), 1.0, atol=1e-4)

    # Ragged batch (exercises batch padding path).
    B2 = 5
    x2 = jax.random.randint(k_x2, (B2, 3, 3), -1, 2).astype(jnp.float32)
    probs2, value2 = tictactoe_acnet_forward(x2, packed)
    jax.block_until_ready((probs2, value2))
    probs2_ref, value2_ref = _reference(x2, raw_params)
    assert probs2.shape == (B2, 9) and value2.shape == (B2, 1)
    assert jnp.allclose(probs2, probs2_ref, atol=1e-4)
    assert jnp.allclose(value2, value2_ref, atol=1e-4)
    assert jnp.allclose(jnp.sum(probs2, axis=-1), 1.0, atol=1e-4)

    print("KERNEL_OK")
</pallas_src>

<mosaic_0001>
module attributes {stable_mosaic.version = 11 : i64} {
  func.func @acnet_kernel(%arg0: i32, %arg1: memref<8x16xf32, #tpu.memory_space<vmem>>, %arg2: memref<16x64xf32, #tpu.memory_space<vmem>>, %arg3: memref<64x128xf32, #tpu.memory_space<vmem>>, %arg4: memref<1x128xf32, #tpu.memory_space<vmem>>, %arg5: memref<8x128xf32, #tpu.memory_space<vmem>>) attributes {dimension_semantics = [#tpu.dimension_semantics<parallel>], iteration_bounds = array<i64: 1>, scalar_prefetch = 0 : i64, scratch_operands = 0 : i64, tpu.core_type = #tpu.core_type<tc>, window_params = [{transform_indices = @transform_0, window_bounds = array<i64: 8, 16>}, {pipeline_mode = #tpu.pipeline_mode<synchronous>, transform_indices = @transform_1, window_bounds = array<i64: 16, 64>}, {pipeline_mode = #tpu.pipeline_mode<synchronous>, transform_indices = @transform_2, window_bounds = array<i64: 64, 128>}, {pipeline_mode = #tpu.pipeline_mode<synchronous>, transform_indices = @transform_3, window_bounds = array<i64: 1, 128>}, {transform_indices = @transform_4, window_bounds = array<i64: 8, 128>}]} {
    %c0 = arith.constant 0 : index
    %c0_0 = arith.constant 0 : index
    %0 = vector.load %arg1[%c0, %c0_0] : memref<8x16xf32, #tpu.memory_space<vmem>>, vector<8x16xf32>
    %c0_1 = arith.constant 0 : index
    %c0_2 = arith.constant 0 : index
    %1 = vector.load %arg2[%c0_1, %c0_2] : memref<16x64xf32, #tpu.memory_space<vmem>>, vector<16x64xf32>
    %cst = arith.constant dense<0.000000e+00> : vector<8x64xf32>
    %2 = tpu.matmul %0, %1, %cst {dimension_numbers = #tpu.dot_dimension_numbers<[1], [0], [0], [1], [0, 0, 1, 1], [], []>, precision = #tpu.contract_precision<fp32>} : vector<8x16xf32>, vector<16x64xf32>, vector<8x64xf32> -> vector<8x64xf32>
    %cst_3 = arith.constant 0.000000e+00 : f32
    %3 = vector.broadcast %cst_3 : f32 to vector<8x64xf32>
    %4 = arith.maximumf %2, %3 : vector<8x64xf32>
    %c0_4 = arith.constant 0 : index
    %c0_5 = arith.constant 0 : index
    %5 = vector.load %arg3[%c0_4, %c0_5] : memref<64x128xf32, #tpu.memory_space<vmem>>, vector<64x128xf32>
    %cst_6 = arith.constant dense<0.000000e+00> : vector<8x128xf32>
    %6 = tpu.matmul %4, %5, %cst_6 {dimension_numbers = #tpu.dot_dimension_numbers<[1], [0], [0], [1], [0, 0, 1, 1], [], []>, precision = #tpu.contract_precision<fp32>} : vector<8x64xf32>, vector<64x128xf32>, vector<8x128xf32> -> vector<8x128xf32>
    %c0_7 = arith.constant 0 : index
    %c0_8 = arith.constant 0 : index
    %7 = vector.load %arg4[%c0_7, %c0_8] : memref<1x128xf32, #tpu.memory_space<vmem>>, vector<1x128xf32>
    %8 = vector.broadcast %7 : vector<1x128xf32> to vector<8x128xf32>
    %9 = arith.addf %6, %8 : vector<8x128xf32>
    %10 = tpu.iota {dimensions = array<i32: 1>} : vector<8x128xi32>
    %c9_i32 = arith.constant 9 : i32
    %11 = vector.broadcast %c9_i32 : i32 to vector<8x128xi32>
    %12 = arith.cmpi slt, %10, %11 : vector<8x128xi32>
    %cst_9 = arith.constant 0xFF800000 : f32
    %13 = vector.broadcast %cst_9 : f32 to vector<8x128xf32>
    %14 = arith.select %12, %9, %13 : vector<8x128xi1>, vector<8x128xf32>
    %cst_10 = arith.constant dense<0xFF800000> : vector<8xf32>
    %15 = vector.multi_reduction <maximumf>, %14, %cst_10 [1] : vector<8x128xf32> to vector<8xf32>
    %16 = vector.shape_cast %15 : vector<8xf32> to vector<8x1xf32>
    %17 = vector.broadcast %16 : vector<8x1xf32> to vector<8x128xf32>
    %18 = arith.subf %14, %17 : vector<8x128xf32>
    %19 = math.exp %18 : vector<8x128xf32>
    %cst_11 = arith.constant dense<0.000000e+00> : vector<8xf32>
    %20 = vector.multi_reduction <add>, %19, %cst_11 [1] : vector<8x128xf32> to vector<8xf32>
    %21 = vector.shape_cast %20 : vector<8xf32> to vector<8x1xf32>
    %22 = vector.broadcast %21 : vector<8x1xf32> to vector<8x128xf32>
    %23 = arith.divf %19, %22 : vector<8x128xf32>
    %24 = math.tanh %9 : vector<8x128xf32>
    %c9_i32_12 = arith.constant 9 : i32
    %25 = vector.broadcast %c9_i32_12 : i32 to vector<8x128xi32>
    %26 = arith.cmpi eq, %10, %25 : vector<8x128xi32>
    %27 = arith.select %26, %24, %23 : vector<8x128xi1>, vector<8x128xf32>
    %c0_13 = arith.constant 0 : index
    %c0_14 = arith.constant 0 : index
    %28 = vector.load %arg5[%c0_13, %c0_14] : memref<8x128xf32, #tpu.memory_space<vmem>>, vector<8x128xf32>
    tpu.vector_store %arg5[%c0_13, %c0_14], %27 {strides = array<i32>} : memref<8x128xf32, #tpu.memory_space<vmem>>, vector<8x128xf32>,
    return
  }
  func.func @transform_0(%arg0: i32) -> (i32, i32) {
    %c0_i32 = arith.constant 0 : i32
    %c0_i32_0 = arith.constant 0 : i32
    return %arg0, %c0_i32 : i32, i32
  }
  func.func @transform_1(%arg0: i32) -> (i32, i32) {
    %c0_i32 = arith.constant 0 : i32
    %c0_i32_0 = arith.constant 0 : i32
    %c0_i32_1 = arith.constant 0 : i32
    return %c0_i32, %c0_i32_0 : i32, i32
  }
  func.func @transform_2(%arg0: i32) -> (i32, i32) {
    %c0_i32 = arith.constant 0 : i32
    %c0_i32_0 = arith.constant 0 : i32
    %c0_i32_1 = arith.constant 0 : i32
    return %c0_i32, %c0_i32_0 : i32, i32
  }
  func.func @transform_3(%arg0: i32) -> (i32, i32) {
    %c0_i32 = arith.constant 0 : i32
    %c0_i32_0 = arith.constant 0 : i32
    %c0_i32_1 = arith.constant 0 : i32
    return %c0_i32, %c0_i32_0 : i32, i32
  }
  func.func @transform_4(%arg0: i32) -> (i32, i32) {
    %c0_i32 = arith.constant 0 : i32
    %c0_i32_0 = arith.constant 0 : i32
    return %arg0, %c0_i32 : i32, i32
  }
}

</mosaic_0001>

<bundles_post_ra>
// kernel: tpu_custom_call.1
= control target key start
LH: loop header
LB: loop body
LE: loop exit
PB: predicated region body
PF: predicated region fallthrough
CT: control target
= control target key end

     0   :  { %9 = vsyncpa [#allocation3], 0  ;;  %s1700_s0 = inlined_call_operand.hbm [shape: f32[8,16], index: 0, kind: input, shape index: {}]   ;;  %s1701_s1 = inlined_call_operand.hbm [shape: f32[16,64], index: 1, kind: input, shape index: {}]   ;;  %s1702_s2 = inlined_call_operand.hbm [shape: f32[64,128], index: 2, kind: input, shape index: {}]   ;;  %s1703_s3 = inlined_call_operand.vmem [shape: f32[1,128], index: 3, kind: input, shape index: {}]   ;;  %s1704_s4 = inlined_call_operand.hbm [shape: f32[8,128], index: 4, kind: output, shape index: {}]  }
   0x1   :  { %10 = vsyncpa [#allocation6], 0 }
   0x2   :  { %11 = vsyncpa [#allocation4], 0  ;;  %s1442_s15 = smov [#allocation5]  }
   0x3   :  { %s27_s16 = sshll.u32 %s1442_s15, 4  ;;  %s28_s16 = int_to_ptr.vmem [resolvable:$true] %s27_s16 }
   0x4   :  { %s1364_s17 = scalar_lea.vmem %s28_s16, 256  ;;  %p1369_p1 = scmp.lt.s32.totalorder %s28_s16, %s28_s16 }
   0x5   :  { %p1365_p0 = scmp.ne.s32.totalorder %s28_s16, %s1364_s17  ;;  %p1370_p2 = scmp.lt.s32.totalorder %s1364_s17, %s1364_s17 }
   0x7   :  { %p1371_p3 = por %p1370_p2, %p1369_p1 }
   0x9   :  { %p1372_p4 = pnand %p1371_p3, %p1365_p0 }
   0xb   :  { %1375 = shalt.err (!%p1372_p4)
}
   0xc   :  { %s1443_s18 = smov 128   ;;  %s1444_s19 = smov 8  }
   0xd   :  { %33 = dma.hbm_to_vmem [thread:$0]  %s1701_s1, 256, %s28_s16, [#allocation6], %s1443_s18, %s1443_s18, %s1444_s19  }
   0xe   :  { %s1445_s22 = smov [#allocation2]   ;;  %s1446_s24 = smov [#allocation7]  }
   0xf   :  { %s18_s23 = sshll.u32 %s1445_s22, 4  ;;  %s39_s25 = sshll.u32 %s1446_s24, 4  ;;  %s19_s23 = int_to_ptr.vmem [resolvable:$true] %s18_s23  ;;  %s40_s25 = int_to_ptr.vmem [resolvable:$true] %s39_s25 }
  0x10   :  { %s1384_s26 = scalar_lea.vmem %s19_s23, 128  ;;  %p1389_p6 = scmp.lt.s32.totalorder %s19_s23, %s19_s23 }
  0x11   :  { %p1385_p5 = scmp.ne.s32.totalorder %s19_s23, %s1384_s26  ;;  %p1390_p7 = scmp.lt.s32.totalorder %s1384_s26, %s1384_s26 }
  0x13   :  { %p1391_p8 = por %p1390_p7, %p1389_p6 }
  0x15   :  { %p1392_p9 = pnand %p1391_p8, %p1385_p5 }
  0x17   :  { %1395 = shalt.err (!%p1392_p9)
}
  0x18   :  { %21 = dma.hbm_to_vmem [thread:$0]  %s1700_s0, 128, %s19_s23, [#allocation3]  }
  0x19   :  { %s1404_s29 = scalar_lea.vmem %s40_s25, 1024  ;;  %p1409_p11 = scmp.lt.s32.totalorder %s40_s25, %s40_s25 }
  0x1a   :  { %p1405_p10 = scmp.ne.s32.totalorder %s40_s25, %s1404_s29  ;;  %p1410_p12 = scmp.lt.s32.totalorder %s1404_s29, %s1404_s29 }
  0x1c   :  { %p1411_p13 = por %p1410_p12, %p1409_p11 }
  0x1e   :  { %p1412_p0 = pnand %p1411_p13, %p1405_p10 }
  0x20   :  { %1415 = shalt.err (!%p1412_p0)
}
  0x21   :  { %45 = dma.hbm_to_vmem [thread:$0]  %s1702_s2, 1024, %s40_s25, [#allocation6], %s1443_s18, %s1443_s18, %s1444_s19  }
  0x22   :  { %1436 = dma.done.wait [#allocation3], 128  }
  0x23   :  { %1437 = vsyncadd [#allocation3], 4294967168 }
  0x24   :  { %1438 = dma.done.wait [#allocation6], 1280  }
  0x25   :  { %1439 = vsyncadd [#allocation6], 4294966016  ;;  %v1447_v0 = vmov 0.0   ;;  %vm1448_vm0 = vmmov 0   ;;  %vm60_vm1 = vcmask 130048   ;;  %v59_v1 = vld [vmem:[#allocation5 + $0x8] sm:$0xff] }
  0x26   :  { %1186 = vmatprep.subr.mxu0 %v1447_v0  ;;  %1193 = vmatprep.subr.mxu1 %v1447_v0  ;;  %v58_v2 = vld [vmem:[#allocation5] sm:$0xff]  ;;  %v57_v3 = vld [vmem:[#allocation2] sm:$0xff]  ;;  %v93_v4 = vand.u32 4294901760, %v59_v1  ;;  %v531_v20 = vld [vmem:[#allocation7 + $0x38] sm:$0xff]  ;;  %vm539_vm2 = vcmask 523264  }
  0x27   :  { %1190 = vmatprep.mubr.msk.f32.mxu0 %vm1448_vm0, %v1447_v0  ;;  %1197 = vmatprep.mubr.msk.f32.mxu1 %vm1448_vm0, %v1447_v0  ;;  %v96_v5 = vand.u32 4294901760, %v58_v2  ;;  %v62_v6 = vsel %vm60_vm1, %v57_v3, 0  ;;  %v1514_v21 = vand.u32 4294901760, %v531_v20  ;;  %v530_v22 = vld [vmem:[#allocation7 + $0x30] sm:$0xff]  ;;  %v529_v25 = vld [vmem:[#allocation7 + $0x28] sm:$0xff]  ;;  %v528_v29 = vld [vmem:[#allocation7 + $0x20] sm:$0xff] }
  0x28   :  { %v131_v7 = vand.u32 4294901760, %v62_v6  ;;  %1187 = vmatpush3.msra.mxu0 %v93_v4  ;;  %v171_v8 = vsub.f32 %v59_v1, %v93_v4  ;;  %v1519_v24 = vand.u32 4294901760, %v530_v22  ;;  %v1527_v28 = vand.u32 4294901760, %v529_v25  ;;  %v527_v34 = vld [vmem:[#allocation7 + $0x18] sm:$0xff]  ;;  %v526_v40 = vld [vmem:[#allocation7 + $0x10] sm:$0xff]  ;;  %v525_v46 = vld [vmem:[#allocation7 + $0x8] sm:$0xff] }
  0x29   :  { %v178_v9 = vsub.f32 %v58_v2, %v96_v5  ;;  %1188 = vmatprep.subr.mxu0 %v1447_v0  ;;  %v1517_v23 = vsub.f32 %v531_v20, %v1514_v21  ;;  %v1538_v33 = vand.u32 4294901760, %v528_v29  ;;  %v1550_v39 = vand.u32 4294901760, %v527_v34  ;;  %v524_v52 = vld [vmem:[#allocation7] sm:$0xff] }
  0x2a   :  { %v132_v10 = vsub.f32 %v62_v6, %v131_v7  ;;  %1189 = vmatpush3.msra.mxu0 %v96_v5  ;;  %v172_v11 = vand.u32 4294901760, %v171_v8  ;;  %v1525_v27 = vsub.f32 %v530_v22, %v1519_v24  ;;  %v1536_v32 = vsub.f32 %v529_v25, %v1527_v28 }
  0x2b   :  { %v179_v12 = vand.u32 4294901760, %v178_v9  ;;  %1200 = vmatprep.subr.mxu0 %v1447_v0  ;;  %v645_v26 = vand.u32 4294901760, %v1517_v23  ;;  %v1547_v38 = vsub.f32 %v528_v29, %v1538_v33  ;;  %v1557_v44 = vand.u32 4294901760, %v526_v40 }
  0x2c   :  { %v133_v13 = vand.u32 4294901760, %v132_v10  ;;  %v173_v14 = vsub.f32 %v171_v8, %v172_v11  ;;  %v652_v31 = vand.u32 4294901760, %v1525_v27  ;;  %v659_v37 = vand.u32 4294901760, %v1536_v32 }
  0x2d   :  { %v180_v15 = vsub.f32 %v178_v9, %v179_v12  ;;  %v646_v30 = vsub.f32 %v1517_v23, %v645_v26  ;;  %v666_v43 = vand.u32 4294901760, %v1547_v38  ;;  %v1561_v45 = vsub.f32 %v527_v34, %v1550_v39 }
  0x2e   :  { %v134_v16 = vsub.f32 %v132_v10, %v133_v13  ;;  %v174_v17 = vand.u32 4294901760, %v173_v14  ;;  %v653_v36 = vsub.f32 %v1525_v27, %v652_v31  ;;  %v660_v42 = vsub.f32 %v1536_v32, %v659_v37 }
  0x2f   :  { %v181_v18 = vand.u32 4294901760, %v180_v15  ;;  %v647_v35 = vand.u32 4294901760, %v646_v30  ;;  %v667_v48 = vsub.f32 %v1547_v38, %v666_v43  ;;  %v1568_v49 = vsub.f32 %v526_v40, %v1557_v44 }
  0x30   :  { %v135_v19 = vand.u32 4294901760, %v134_v16  ;;  %1194 = vmatpush3.msra.mxu1 %v174_v17  ;;  %v654_v41 = vand.u32 4294901760, %v653_v36  ;;  %v661_v47 = vand.u32 4294901760, %v660_v42  ;;  %v1570_v50 = vand.u32 4294901760, %v525_v46 }
  0x31   :  { %1195 = vmatprep.subr.mxu1 %v1447_v0  ;;  %v673_v51 = vand.u32 4294901760, %v1561_v45  ;;  %v668_v53 = vand.u32 4294901760, %v667_v48  ;;  %v680_v54 = vand.u32 4294901760, %v1568_v49  ;;  %v1580_v56 = vand.u32 4294901760, %v524_v52 }
  0x32   :  { %1191 = vmatmul.mubr.f32.vlgmr.msra.gmra.mxu0 %v135_v19  ;;  %1196 = vmatpush3.msra.mxu1 %v181_v18  ;;  %v1578_v55 = vsub.f32 %v525_v46, %v1570_v50 }
  0x33   :  { %1201 = vmatpush3.msra.mxu0 %v171_v8  ;;  %1198 = vmatmul.mubr.f32.vlgmr.msra.gmra.mxu1 %v131_v7  ;;  %v674_v57 = vsub.f32 %v1561_v45, %v673_v51  ;;  %v681_v58 = vsub.f32 %v1568_v49, %v680_v54  ;;  %v1593_v60 = vsub.f32 %v524_v52, %v1580_v56 }
  0x34   :  { %1202 = vmatprep.subr.mxu0 %v1447_v0  ;;  %1207 = vmatprep.subr.mxu1 %v1447_v0  ;;  %v687_v59 = vand.u32 4294901760, %v1578_v55 }
  0x35   :  { %1203 = vmatpush3.msra.mxu0 %v178_v9  ;;  %1204 = vmatprep.mubr.msk.f32.mxu0 %vm1448_vm0, %v1447_v0  ;;  %v675_v61 = vand.u32 4294901760, %v674_v57  ;;  %v682_v62 = vand.u32 4294901760, %v681_v58  ;;  %v694_v1 = vand.u32 4294901760, %v1593_v60 }
  0x36   :  { %1208 = vmatpush3.msra.mxu1 %v93_v4  ;;  %1205 = vmatmul.mubr.f32.vlgmr.msra.gmra.mxu0 %v132_v10  ;;  %v688_v63 = vsub.f32 %v1578_v55, %v687_v59 }
  0x37   :  { %1209 = vmatprep.subr.mxu1 %v1447_v0  ;;  %1214 = vmatprep.subr.mxu0 %v1447_v0  ;;  %v695_v3 = vsub.f32 %v1593_v60, %v694_v1 }
  0x38   :  { %1210 = vmatpush3.msra.mxu1 %v96_v5  ;;  %1211 = vmatprep.mubr.msk.f32.mxu1 %vm1448_vm0, %v1447_v0  ;;  %v689_v2 = vand.u32 4294901760, %v688_v63 }
  0x39   :  { %1215 = vmatpush3.msra.mxu0 %v172_v11  ;;  %1212 = vmatmul.mubr.f32.vlgmr.msra.gmra.mxu1 %v133_v13 }
  0x3a   :  { %1216 = vmatprep.subr.mxu0 %v1447_v0  ;;  %1221 = vmatprep.subr.mxu1 %v1447_v0 }
  0x3b   :  { %1217 = vmatpush3.msra.mxu0 %v179_v12  ;;  %1218 = vmatprep.mubr.msk.f32.mxu0 %vm1448_vm0, %v1447_v0 }
  0x3c   :  { %1222 = vmatpush3.msra.mxu1 %v93_v4  ;;  %1219 = vmatmul.mubr.f32.vlgmr.msra.gmra.mxu0 %v131_v7  ;;  %v696_v4 = vand.u32 4294901760, %v695_v3 }
  0x3d   :  { %1223 = vmatprep.subr.mxu1 %v1447_v0  ;;  %1225 = vmatprep.mubr.msk.f32.mxu1 %vm1448_vm0, %v1447_v0 }
  0x3e   :  { %1224 = vmatpush3.msra.mxu1 %v96_v5  ;;  %1228 = vmatprep.subr.mxu0 %v1447_v0 }
  0x3f   :  { %1226 = vmatmul.mubr.f32.vlgmr.msra.gmra.mxu1 %v131_v7  ;;  %1247 = vmatprep.subr.mxu1 %v1447_v0 }
  0x40   :  { %1263 = vmatprep.mubr.msk.f32.mxu1 %vm1448_vm0, %v1447_v0  ;;  %1244 = vmatprep.mubr.msk.f32.mxu0 %vm1448_vm0, %v1447_v0 }
  0x41   :  { %1229 = vmatpush3.msra.mxu0 %v1514_v21  ;;  %1248 = vmatpush3.msra.mxu1 %v647_v35 }
  0x42   :  { %1230 = vmatprep.subr.mxu0 %v1447_v0  ;;  %1249 = vmatprep.subr.mxu1 %v1447_v0 }
  0x43   :  { %1231 = vmatpush3.msra.mxu0 %v1519_v24  ;;  %1250 = vmatpush3.msra.mxu1 %v654_v41  ;;  %v1080_v41 = vlaneseq }
  0x44   :  { %1232 = vmatprep.subr.mxu0 %v1447_v0  ;;  %1251 = vmatprep.subr.mxu1 %v1447_v0 }
  0x45   :  { %1233 = vmatpush3.msra.mxu0 %v1527_v28  ;;  %1252 = vmatpush3.msra.mxu1 %v661_v47 }
  0x46   :  { %1234 = vmatprep.subr.mxu0 %v1447_v0  ;;  %1253 = vmatprep.subr.mxu1 %v1447_v0 }
  0x47   :  { %1235 = vmatpush3.msra.mxu0 %v1538_v33  ;;  %1254 = vmatpush3.msra.mxu1 %v668_v53 }
  0x48   :  { %1236 = vmatprep.subr.mxu0 %v1447_v0  ;;  %1255 = vmatprep.subr.mxu1 %v1447_v0 }
  0x49   :  { %1237 = vmatpush3.msra.mxu0 %v1550_v39  ;;  %1256 = vmatpush3.msra.mxu1 %v675_v61 }
  0x4a   :  { %1238 = vmatprep.subr.mxu0 %v1447_v0  ;;  %1257 = vmatprep.subr.mxu1 %v1447_v0 }
  0x4b   :  { %1239 = vmatpush3.msra.mxu0 %v1557_v44  ;;  %1258 = vmatpush3.msra.mxu1 %v682_v62 }
  0x4c   :  { %1240 = vmatprep.subr.mxu0 %v1447_v0  ;;  %1259 = vmatprep.subr.mxu1 %v1447_v0 }
  0x4d   :  { %1241 = vmatpush3.msra.mxu0 %v1570_v50  ;;  %1260 = vmatpush3.msra.mxu1 %v689_v2 }
  0x4e   :  { %1242 = vmatprep.subr.mxu0 %v1447_v0  ;;  %1261 = vmatprep.subr.mxu1 %v1447_v0 }
  0x4f   :  { %1243 = vmatpush3.msra.mxu0 %v1580_v56  ;;  %1262 = vmatpush3.msra.mxu1 %v696_v4 }
  0x50   :  { %1266 = vmatprep.subr.mxu0 %v1447_v0  ;;  %1285 = vmatprep.subr.mxu1 %v1447_v0 }
  0xf2   :  { %v137_v5 = vpop.f32.mrf.mxu0 }
  0xf3   :  { %v218_v7 = vpop.f32.mrf.mxu1 }
  0xf4   :  { %v1192_v6 = vpop.f32.mrf.mxu0  ;;  %v219_v8 = vadd.f32 %v218_v7, %v137_v5 }
  0xf5   :  { %v1199_v9 = vpop.f32.mrf.mxu1 }
  0xf6   :  { %v294_v10 = vpop.f32.mrf.mxu0 }
  0xf7   :  { %v295_v11 = vadd.f32 %v294_v10, %v219_v8 }
  0xf8   :  { %v1206_v12 = vpop.f32.mrf.mxu0 }
  0xf9   :  { %v369_v13 = vpop.f32.mrf.mxu1 }
  0xfa   :  { %v370_v14 = vadd.f32 %v369_v13, %v295_v11 }
  0xfb   :  { %v1213_v15 = vpop.f32.mrf.mxu1 }
  0xfc   :  { %v446_v16 = vpop.f32.mrf.mxu0 }
  0xfd   :  { %v447_v17 = vadd.f32 %v446_v16, %v370_v14 }
  0xfe   :  { %v1220_v18 = vpop.f32.mrf.mxu0 }
  0xff   :  { %v519_v19 = vpop.f32.mrf.mxu1 }
 0x100   :  { %v520_v20 = vadd.f32 %v519_v19, %v447_v17 }
 0x101   :  { %v1227_v22 = vpop.f32.mrf.mxu1 }
 0x102   :  { %v523_v25 = vmax.f32 %v520_v20, 0.0 }
 0x104   :  { %v541_v29 = vsel %vm539_vm2, %v523_v25, 0 }
 0x105   :  { %v1610_v30 = vand.u32 4294901760, %v541_v29 }
 0x107   :  { %v617_v34 = vsub.f32 %v541_v29, %v1610_v30  ;;  %1264 = vmatmul.mubr.f32.vlgmr.msra.gmra.mxu1 %v1610_v30 }
 0x108   :  { %1286 = vmatpush3.msra.mxu1 %v1514_v21  ;;  %1301 = vmatprep.mubr.msk.f32.mxu1 %vm1448_vm0, %v1447_v0 }
 0x109   :  { %v618_v35 = vand.u32 4294901760, %v617_v34  ;;  %1287 = vmatprep.subr.mxu1 %v1447_v0 }
 0x10a   :  { %1288 = vmatpush3.msra.mxu1 %v1519_v24 }
 0x10b   :  { %1289 = vmatprep.subr.mxu1 %v1447_v0  ;;  %v619_v36 = vsub.f32 %v617_v34, %v618_v35 }
 0x10c   :  { %1290 = vmatpush3.msra.mxu1 %v1527_v28 }
 0x10d   :  { %1291 = vmatprep.subr.mxu1 %v1447_v0  ;;  %v620_v40 = vand.u32 4294901760, %v619_v36 }
 0x10e   :  { %1292 = vmatpush3.msra.mxu1 %v1538_v33 }
 0x10f   :  { %1293 = vmatprep.subr.mxu1 %v1447_v0  ;;  %1245 = vmatmul.mubr.f32.vlgmr.msra.gmra.mxu0 %v620_v40 }
 0x110   :  { %1267 = vmatpush3.msra.mxu0 %v1517_v23  ;;  %1294 = vmatpush3.msra.mxu1 %v1550_v39 }
 0x111   :  { %1268 = vmatprep.subr.mxu0 %v1447_v0  ;;  %1295 = vmatprep.subr.mxu1 %v1447_v0 }
 0x112   :  { %1269 = vmatpush3.msra.mxu0 %v1525_v27  ;;  %1296 = vmatpush3.msra.mxu1 %v1557_v44 }
 0x113   :  { %1270 = vmatprep.subr.mxu0 %v1447_v0  ;;  %1297 = vmatprep.subr.mxu1 %v1447_v0 }
 0x114   :  { %1271 = vmatpush3.msra.mxu0 %v1536_v32  ;;  %1298 = vmatpush3.msra.mxu1 %v1570_v50 }
 0x115   :  { %1272 = vmatprep.subr.mxu0 %v1447_v0  ;;  %1299 = vmatprep.subr.mxu1 %v1447_v0 }
 0x116   :  { %1273 = vmatpush3.msra.mxu0 %v1547_v38  ;;  %1300 = vmatpush3.msra.mxu1 %v1580_v56 }
 0x117   :  { %1274 = vmatprep.subr.mxu0 %v1447_v0  ;;  %1302 = vmatmul.mubr.f32.vlgmr.msra.gmra.mxu1 %v618_v35 }
 0x118   :  { %1323 = vmatprep.subr.mxu1 %v1447_v0  ;;  %1275 = vmatpush3.msra.mxu0 %v1561_v45 }
 0x119   :  { %1324 = vmatpush3.msra.mxu1 %v1514_v21  ;;  %1276 = vmatprep.subr.mxu0 %v1447_v0 }
 0x11a   :  { %1325 = vmatprep.subr.mxu1 %v1447_v0  ;;  %1277 = vmatpush3.msra.mxu0 %v1568_v49 }
 0x11b   :  { %1326 = vmatpush3.msra.mxu1 %v1519_v24  ;;  %1278 = vmatprep.subr.mxu0 %v1447_v0 }
 0x11c   :  { %1327 = vmatprep.subr.mxu1 %v1447_v0  ;;  %1279 = vmatpush3.msra.mxu0 %v1578_v55 }
 0x11d   :  { %1328 = vmatpush3.msra.mxu1 %v1527_v28  ;;  %1280 = vmatprep.subr.mxu0 %v1447_v0 }
 0x11e   :  { %1329 = vmatprep.subr.mxu1 %v1447_v0  ;;  %1281 = vmatpush3.msra.mxu0 %v1593_v60 }
 0x11f   :  { %1282 = vmatprep.mubr.msk.f32.mxu0 %vm1448_vm0, %v1447_v0  ;;  %1330 = vmatpush3.msra.mxu1 %v1538_v33  ;;  %v1113_v33 = vld [vmem:[%s1703_s3] ss:$0 sm:$0xff]  ;;  %s1449_s3 = smov [#allocation8]  }
 0x120   :  { %1283 = vmatmul.mubr.f32.vlgmr.msra.gmra.mxu0 %v617_v34  ;;  %1304 = vmatprep.subr.mxu0 %v1447_v0  ;;  %s1103_s5 = sshll.u32 %s1449_s3, 4  ;;  %s1104_s5 = int_to_ptr.vmem [resolvable:$true] %s1103_s5 }
 0x121   :  { %1331 = vmatprep.subr.mxu1 %v1447_v0  ;;  %1305 = vmatpush3.msra.mxu0 %v645_v26  ;;  %s1416_s6 = scalar_lea.vmem %s1104_s5, 128  ;;  %p1421_p2 = scmp.lt.s32.totalorder %s1104_s5, %s1104_s5 }
 0x122   :  { %1332 = vmatpush3.msra.mxu1 %v1550_v39  ;;  %1306 = vmatprep.subr.mxu0 %v1447_v0  ;;  %p1417_p1 = scmp.ne.s32.totalorder %s1104_s5, %s1416_s6  ;;  %p1422_p3 = scmp.lt.s32.totalorder %s1416_s6, %s1416_s6 }
 0x123   :  { %1333 = vmatprep.subr.mxu1 %v1447_v0  ;;  %1307 = vmatpush3.msra.mxu0 %v652_v31 }
 0x124   :  { %1334 = vmatpush3.msra.mxu1 %v1557_v44  ;;  %1308 = vmatprep.subr.mxu0 %v1447_v0  ;;  %p1423_p4 = por %p1422_p3, %p1421_p2 }
 0x125   :  { %1335 = vmatprep.subr.mxu1 %v1447_v0  ;;  %1309 = vmatpush3.msra.mxu0 %v659_v37 }
 0x126   :  { %1336 = vmatpush3.msra.mxu1 %v1570_v50  ;;  %1310 = vmatprep.subr.mxu0 %v1447_v0  ;;  %p1424_p5 = pnand %p1423_p4, %p1417_p1 }
 0x127   :  { %1337 = vmatprep.subr.mxu1 %v1447_v0  ;;  %1311 = vmatpush3.msra.mxu0 %v666_v43  ;;  %v1081_v43 = vand.u32 127, %v1080_v41 }
 0x128   :  { %1338 = vmatpush3.msra.mxu1 %v1580_v56  ;;  %1339 = vmatprep.mubr.msk.f32.mxu1 %vm1448_vm0, %v1447_v0 }
 0x129   :  { %1312 = vmatprep.subr.mxu0 %v1447_v0  ;;  %1340 = vmatmul.mubr.f32.vlgmr.msra.gmra.mxu1 %v1610_v30  ;;  %vm1082_vm3 = vcmp.lt.s32.totalorder %v1081_v43, 9  ;;  %vm1094_vm4 = vcmp.eq.s32.totalorder %v1081_v43, 9 }
 0x12a   :  { %1313 = vmatpush3.msra.mxu0 %v673_v51  ;;  %1320 = vmatprep.mubr.msk.f32.mxu0 %vm1448_vm0, %v1447_v0 }
 0x12b   :  { %1314 = vmatprep.subr.mxu0 %v1447_v0 }
 0x12c   :  { %1315 = vmatpush3.msra.mxu0 %v680_v54 }
 0x12d   :  { %1316 = vmatprep.subr.mxu0 %v1447_v0 }
 0x12e   :  { %1317 = vmatpush3.msra.mxu0 %v687_v59 }
 0x12f   :  { %1318 = vmatprep.subr.mxu0 %v1447_v0 }
 0x130   :  { %1319 = vmatpush3.msra.mxu0 %v694_v1 }
 0x131   :  { %1321 = vmatmul.mubr.f32.vlgmr.msra.gmra.mxu0 %v1610_v30 }
 0x1c7   :  { %v733_v21 = vpop.f32.mrf.mxu1 }
 0x1c9   :  { %v1265_v23 = vpop.f32.mrf.mxu1 }
 0x1cf   :  { %v622_v24 = vpop.f32.mrf.mxu0 }
 0x1d0   :  { %v623_v37 = vadd.f32 %v1113_v33, %v622_v24 }
 0x1d1   :  { %v1246_v26 = vpop.f32.mrf.mxu0 }
 0x1d2   :  { %v734_v0 = vadd.f32 %v733_v21, %v623_v37 }
 0x1d7   :  { %v902_v27 = vpop.f32.mrf.mxu1 }
 0x1d9   :  { %v1303_v28 = vpop.f32.mrf.mxu1 }
 0x1e0   :  { %v821_v31 = vpop.f32.mrf.mxu0 }
 0x1e1   :  { %v822_v42 = vadd.f32 %v821_v31, %v734_v0 }
 0x1e2   :  { %v1284_v32 = vpop.f32.mrf.mxu0 }
 0x1e3   :  { %v903_v44 = vadd.f32 %v902_v27, %v822_v42 }
 0x1e9   :  { %v1076_v38 = vpop.f32.mrf.mxu1 }
 0x1eb   :  { %v1341_v39 = vpop.f32.mrf.mxu1 }
 0x1f1   :  { %v997_v45 = vpop.f32.mrf.mxu0 }
 0x1f2   :  { %v998_v46 = vadd.f32 %v997_v45, %v903_v44 }
 0x1f3   :  { %v1322_v47 = vpop.f32.mrf.mxu0 }
 0x1f4   :  { %v1077_v48 = vadd.f32 %v1076_v38, %v998_v46 }
 0x1f6   :  { %v1083_v49 = vsel %vm1082_vm3, %v1077_v48, -inf }
 0x1f7   :  { %1084 = vmax.xlane.f32.xlu0 %v1083_v49 }
 0x280   :  { %v1085_v50 = vpop.xlane.xlu0 %1084 }
 0x281   :  { %v1086_v51 = vsub.f32 %v1083_v49, %v1085_v50 }
 0x283   :  { %v1087_v52 = vmul.f32 1.442695, %v1086_v51 }
 0x285   :  { %1350 = vpow2.f32 %v1087_v52 }
 0x292   :  { %v1351_v53 = vpop.eup %1350 }
 0x293   :  { %1089 = vadd.xlane.f32.xlu0 %v1351_v53 }
 0x31c   :  { %v1090_v54 = vpop.xlane.xlu0 %1089 }
 0x31d   :  { %1352 = vrcp.f32 %v1090_v54 }
 0x31e   :  { %1354 = vtanh.f32 %v1077_v48 }
 0x32a   :  { %v1353_v55 = vpop.eup %1352 }
 0x32b   :  { %v1092_v56 = vmul.f32 %v1353_v55, %v1351_v53  ;;  %v1355_v57 = vpop.eup %1354 }
 0x32d   :  { %v1095_v58 = vsel %vm1094_vm4, %v1355_v57, %v1092_v56 }
 0x32e   :  { %1096 = vst [vmem:[#allocation8] sm:$0xff] %v1095_v58 }
 0x32f   :  { %1427 = shalt.err (!%p1424_p5)
}
 0x330   :  { %1106 = dma.vmem_to_hbm [thread:$0]  %s1104_s5, 128, %s1704_s4, [#allocation4]  }
 0x331   :  { %1440 = dma.done.wait [#allocation4], 128  }
 0x332   :  { %1441 = vsyncadd [#allocation4], 4294967168 }
 0x333   :  { %1110 = vsyncpa [#allocation3], 1 }
 0x334   :  { %1111 = vsyncpa [#allocation6], 1 }
 0x335   :  { %1112 = vsyncpa [#allocation4], 1 }

</bundles_post_ra>
